<compile_context>
chip_gen: v7x
topology: tpu7x:2x2x1
jax: 0.10.0
libtpu: 0.0.40
codegen_flags: <defaults>
</compile_context>

<pallas_src>
import functools
import numpy as np

import jax
import jax.numpy as jnp
from jax.experimental import pallas as pl
from jax.experimental.pallas import tpu as pltpu


def _round_up(x, m):
    return (x + m - 1) // m * m


# ----------------------------- in-kernel math ------------------------------ #

def _erf(x):
    # Abramowitz & Stegun 7.1.26 polynomial (|err| < 1.5e-7) — exp/mul/add/div/where only.
    a1, a2, a3, a4, a5 = 0.254829592, -0.284496736, 1.421413741, -1.453152027, 1.061405429
    p = 0.3275911
    sgn = jnp.where(x >= 0.0, 1.0, -1.0)
    ax = jnp.abs(x)
    t = 1.0 / (1.0 + p * ax)
    poly = ((((a5 * t + a4) * t + a3) * t + a2) * t + a1) * t
    return sgn * (1.0 - poly * jnp.exp(-ax * ax))


def _gelu_exact(x):
    # PyTorch nn.GELU() default = exact erf formulation.
    return 0.5 * x * (1.0 + _erf(x * np.float32(1.0 / np.sqrt(2.0))))


def _cgm_kernel(ctx_ref, z_ref, seg_ref,
                w1_ref, b1_ref, w2_ref, b2_ref, gamma_ref, beta_ref,
                whead_ref, bhead_ref,
                out_ref, *, n_modes, n_features, off_ls, off_w, off_lssum):
    """Whole pipeline in (features, TB) layout — batch on the 128-lane axis."""
    f32 = jnp.float32
    M, D = n_modes, n_features
    K = M * D

    def linear(wT_ref, x, b_ref):
        # y^T = W^T @ x^T + b  — weights pre-transposed in the wrapper, f32 MXU + f32 acc.
        return jnp.dot(wT_ref[...], x, preferred_element_type=f32) + b_ref[...]

    # ---- context encoder: Linear -> GELU -> Linear -> GELU -> LayerNorm -> Linear(heads)
    h = _gelu_exact(linear(w1_ref, ctx_ref[...], b1_ref))          # (ndim, TB)
    h = _gelu_exact(linear(w2_ref, h, b2_ref))                     # (ndim, TB)

    mu = jnp.mean(h, axis=0, keepdims=True)                        # (1, TB)
    var = jnp.mean((h - mu) * (h - mu), axis=0, keepdims=True)     # (1, TB)
    h = (h - mu) * jax.lax.rsqrt(var + 1e-5) * gamma_ref[...] + beta_ref[...]

    # fused, sublane-aligned heads: [loc | pad | log_scale | pad | w | pad | ls_sum | pad]
    heads = linear(whead_ref, h, bhead_ref)                        # (Nh, TB)
    loc = heads[:K]                                                # (K, TB)
    log_scale = heads[off_ls:off_ls + K]                           # (K, TB)
    w_logits = heads[off_w:off_w + M]                              # (M, TB)
    ls_sum = heads[off_lssum:off_lssum + M]                        # (M, TB)  sum_d log_scale

    # ---- Gaussian mixture log-prob
    z_tiled = jnp.tile(z_ref[...], (M, 1))                         # (K, TB) sublane replication
    eps = (z_tiled - loc) * jnp.exp(-log_scale)                    # (K, TB)

    # per-mode sum over the feature dim as ONE small matmul against the 0/1 seg matrix
    quad = jnp.dot(seg_ref[...], eps * eps,
                   preferred_element_type=f32)                     # (M, TB)

    # log softmax of mixture logits over modes (sublane axis)
    wmax = jnp.max(w_logits, axis=0, keepdims=True)                # (1, TB)
    log_weights = (w_logits - wmax) - jnp.log(
        jnp.sum(jnp.exp(w_logits - wmax), axis=0, keepdims=True))  # (M, TB)

    const = np.float32(-0.5 * D * np.log(2.0 * np.pi))
    log_p = const + log_weights - 0.5 * quad - ls_sum              # (M, TB)

    # logsumexp over modes -> lane-dense (1, TB) store, no transpose needed
    m = jnp.max(log_p, axis=0, keepdims=True)
    out_ref[...] = m + jnp.log(jnp.sum(jnp.exp(log_p - m), axis=0, keepdims=True))


# ------------------------------- wrapper ----------------------------------- #

def conditional_gaussian_mixture_logprob(z, context, params, n_modes, n_features,
                                         *, block_b=2048):
    B, C = context.shape
    M, D = n_modes, n_features
    K = M * D
    ndim = params["w1"].shape[1]
    f32 = jnp.float32

    # --- sublane-aligned fused head (== torch.split of the last Linear's output) ---
    loc_pad = _round_up(K, 8)
    ls_pad = _round_up(K, 8)
    w_pad = _round_up(M, 8)
    lssum_pad = _round_up(M, 8)
    off_ls = loc_pad
    off_w = loc_pad + ls_pad
    off_lssum = loc_pad + ls_pad + w_pad
    Nh = off_lssum + lssum_pad

    def padrows(a, n):
        return jnp.pad(a, ((0, n - a.shape[0]), (0, 0)))

    wlocT = params["wloc"].T                                    # (K, ndim)
    wlsT = params["wls"].T                                      # (K, ndim)
    wwT = params["ww"].T                                        # (M, ndim)
    wls_sumT = wlsT.reshape(M, D, ndim).sum(axis=1)             # (M, ndim) folded ls reduction
    wheadT = jnp.concatenate([padrows(wlocT, loc_pad), padrows(wlsT, ls_pad),
                              padrows(wwT, w_pad), padrows(wls_sumT, lssum_pad)], axis=0)

    blocc = params["bloc"].reshape(K, 1)
    blsc = params["bls"].reshape(K, 1)
    bwc = params["bw"].reshape(M, 1)
    bls_sumc = params["bls"].reshape(M, D).sum(axis=1, keepdims=True)
    bheadc = jnp.concatenate([padrows(blocc, loc_pad), padrows(blsc, ls_pad),
                              padrows(bwc, w_pad), padrows(bls_sumc, lssum_pad)], axis=0)

    # --- encoder weights, transposed once for the feature-major kernel ---
    w1T = params["w1"].T                                        # (ndim, C)
    b1c = params["b1"].reshape(ndim, 1)
    w2T = params["w2"].T                                        # (ndim, ndim)
    b2c = params["b2"].reshape(ndim, 1)
    gammac = params["gamma"].reshape(ndim, 1)
    betac = params["beta"].reshape(ndim, 1)

    # 0/1 per-mode segment matrix, VMEM-resident constant (hoisted out of the kernel body)
    seg = (jnp.arange(K, dtype=jnp.int32)[None, :] // D ==
           jnp.arange(M, dtype=jnp.int32)[:, None]).astype(f32)  # (M, K)

    # --- batch tiling: batch on lanes, tile is a multiple of 128; >=2 tiles when possible ---
    Bp128 = _round_up(B, 128)
    TB = min(_round_up(block_b, 128), Bp128)
    if Bp128 >= 256:
        # cap so there are at least 2 grid steps -> both TensorCores get work on v7x
        TB = min(TB, max(128, (Bp128 // 2) // 128 * 128))
    Bp = _round_up(B, TB)
    num_tiles = Bp // TB

    # feature-major, zero-padded inputs (transpose once here, never inside the kernel)
    ctx_fm = jnp.pad(context.astype(f32).T, ((0, 0), (0, Bp - B)))   # (C, Bp)
    z_fm = jnp.pad(z.astype(f32).T, ((0, 0), (0, Bp - B)))           # (D, Bp)

    # explicit scoped-VMEM limit sized from the per-tile footprint (tiny; default is fine
    # everywhere, but set it so large block_b sweeps on v5e don't hit the 16 MiB default)
    per_tile_bytes = 4 * TB * (2 * (C + D) + 2 * ndim + Nh + 4 * K + 4 * M + 8)
    weight_bytes = 8 * (ndim * (C + ndim + 4) + Nh * (ndim + 1) + M * K)
    vmem_limit = int(min(48 << 20, max(16 << 20, 3 * (per_tile_bytes + weight_bytes))))

    def const_spec(a):
        nd = a.ndim
        return pl.BlockSpec(a.shape, lambda i, _nd=nd: (0,) * _nd)  # VMEM-resident across steps

    weights = (seg, w1T, b1c, w2T, b2c, gammac, betac, wheadT, bheadc)

    # TODO(synk): profile on v7x to confirm ("parallel",) actually shards the batch axis
    # across both TensorCores; if not, switch to pltpu.CORE_PARALLEL / an explicit core axis.
    out = pl.pallas_call(
        functools.partial(_cgm_kernel, n_modes=M, n_features=D,
                          off_ls=off_ls, off_w=off_w, off_lssum=off_lssum),
        grid=(num_tiles,),
        in_specs=[pl.BlockSpec((C, TB), lambda i: (0, i)),
                  pl.BlockSpec((D, TB), lambda i: (0, i))]
                 + [const_spec(a) for a in weights],
        out_specs=pl.BlockSpec((1, TB), lambda i: (0, i)),            # lane-dense row per tile
        out_shape=jax.ShapeDtypeStruct((1, Bp), jnp.float32),
        compiler_params=pltpu.CompilerParams(
            dimension_semantics=("parallel",),
            vmem_limit_bytes=vmem_limit),
    )(ctx_fm, z_fm, *weights)
    return out[0, :B]


# --------------------- deterministic parameter init ------------------------ #

def init_params(key, context_size, n_modes, n_features):
    ndim = context_size * 2
    K = n_modes * n_features
    c_out = n_modes + 2 * K
    ks = jax.random.split(key, 3)

    def linear(k, fin, fout):
        bound = 1.0 / np.sqrt(fin)
        kw, kb = jax.random.split(k)
        w = jax.random.uniform(kw, (fin, fout), jnp.float32, -bound, bound)
        b = jax.random.uniform(kb, (1, fout), jnp.float32, -bound, bound)
        return w, b

    w1, b1 = linear(ks[0], context_size, ndim)
    w2, b2 = linear(ks[1], ndim, ndim)
    gamma = jnp.ones((1, ndim), jnp.float32)     # nn.LayerNorm default affine init
    beta = jnp.zeros((1, ndim), jnp.float32)
    w3, b3 = linear(ks[2], ndim, c_out)
    # split the last Linear into the three heads (== torch.split along dim=1)
    ww, wloc, wls = w3[:, :n_modes], w3[:, n_modes:n_modes + K], w3[:, n_modes + K:]
    bw, bloc, bls = b3[:, :n_modes], b3[:, n_modes:n_modes + K], b3[:, n_modes + K:]
    return dict(w1=w1, b1=b1, w2=w2, b2=b2, gamma=gamma, beta=beta,
                ww=ww, bw=bw, wloc=wloc, bloc=bloc, wls=wls, bls=bls)


# ------------------------- plain-JAX reference ------------------------------ #

def ref_logprob(z, context, params, n_modes, n_features):
    h = jax.nn.gelu(context @ params["w1"] + params["b1"], approximate=False)
    h = jax.nn.gelu(h @ params["w2"] + params["b2"], approximate=False)
    mu = jnp.mean(h, axis=-1, keepdims=True)
    var = jnp.mean((h - mu) ** 2, axis=-1, keepdims=True)
    h = (h - mu) / jnp.sqrt(var + 1e-5) * params["gamma"] + params["beta"]
    w = h @ params["ww"] + params["bw"]
    loc = (h @ params["wloc"] + params["bloc"]).reshape(-1, n_modes, n_features)
    log_scale = (h @ params["wls"] + params["bls"]).reshape(-1, n_modes, n_features)
    log_weights = jax.nn.log_softmax(w, axis=1)
    eps = (z[:, None, :] - loc) / jnp.exp(log_scale)
    log_p = (-0.5 * n_features * np.log(2 * np.pi) + log_weights
             - 0.5 * jnp.sum(eps ** 2, axis=2) - jnp.sum(log_scale, axis=2))
    return jax.scipy.special.logsumexp(log_p, axis=1)


if __name__ == "__main__":
    n_modes, n_features, context_size = 4, 8, 16
    B = 8

    key = jax.random.PRNGKey(0)
    kp, kz, kc, kz2, kc2 = jax.random.split(key, 5)
    params = init_params(kp, context_size, n_modes, n_features)
    z = jax.random.normal(kz, (B, n_features), jnp.float32)
    context = jax.random.normal(kc, (B, context_size), jnp.float32)

    # small-shape run (single tile, 128-lane padded batch)
    out = conditional_gaussian_mixture_logprob(z, context, params, n_modes, n_features)
    out = jax.block_until_ready(out)
    ref = ref_logprob(z, context, params, n_modes, n_features)
    assert out.shape == (B,), out.shape
    assert jnp.allclose(out, ref, rtol=1e-4, atol=1e-4), (out, ref)

    # exercise the tiled / padded / multi-step-grid path (TB=128, 2 tiles, 56 padded cols)
    B2 = 200
    z2 = jax.random.normal(kz2, (B2, n_features), jnp.float32)
    context2 = jax.random.normal(kc2, (B2, context_size), jnp.float32)
    out2 = conditional_gaussian_mixture_logprob(z2, context2, params, n_modes, n_features)
    out2 = jax.block_until_ready(out2)
    ref2 = ref_logprob(z2, context2, params, n_modes, n_features)
    assert out2.shape == (B2,), out2.shape
    assert jnp.allclose(out2, ref2, rtol=1e-4, atol=1e-4), (out2, ref2)

    print("KERNEL_OK")
</pallas_src>

<mosaic_0001>
module attributes {stable_mosaic.version = 11 : i64} {
  func.func @_cgm_kernel(%arg0: i32, %arg1: memref<16x128xf32, #tpu.memory_space<vmem>>, %arg2: memref<8x128xf32, #tpu.memory_space<vmem>>, %arg3: memref<4x32xf32, #tpu.memory_space<vmem>>, %arg4: memref<32x16xf32, #tpu.memory_space<vmem>>, %arg5: memref<32x1xf32, #tpu.memory_space<vmem>>, %arg6: memref<32x32xf32, #tpu.memory_space<vmem>>, %arg7: memref<32x1xf32, #tpu.memory_space<vmem>>, %arg8: memref<32x1xf32, #tpu.memory_space<vmem>>, %arg9: memref<32x1xf32, #tpu.memory_space<vmem>>, %arg10: memref<80x32xf32, #tpu.memory_space<vmem>>, %arg11: memref<80x1xf32, #tpu.memory_space<vmem>>, %arg12: memref<1x128xf32, #tpu.memory_space<vmem>>) attributes {dimension_semantics = [#tpu.dimension_semantics<parallel>], iteration_bounds = array<i64: 1>, scalar_prefetch = 0 : i64, scratch_operands = 0 : i64, tpu.core_type = #tpu.core_type<tc>, window_params = [{transform_indices = @transform_0, window_bounds = array<i64: 16, 128>}, {transform_indices = @transform_1, window_bounds = array<i64: 8, 128>}, {pipeline_mode = #tpu.pipeline_mode<synchronous>, transform_indices = @transform_2, window_bounds = array<i64: 4, 32>}, {pipeline_mode = #tpu.pipeline_mode<synchronous>, transform_indices = @transform_3, window_bounds = array<i64: 32, 16>}, {pipeline_mode = #tpu.pipeline_mode<synchronous>, transform_indices = @transform_4, window_bounds = array<i64: 32, 1>}, {pipeline_mode = #tpu.pipeline_mode<synchronous>, transform_indices = @transform_5, window_bounds = array<i64: 32, 32>}, {pipeline_mode = #tpu.pipeline_mode<synchronous>, transform_indices = @transform_6, window_bounds = array<i64: 32, 1>}, {pipeline_mode = #tpu.pipeline_mode<synchronous>, transform_indices = @transform_7, window_bounds = array<i64: 32, 1>}, {pipeline_mode = #tpu.pipeline_mode<synchronous>, transform_indices = @transform_8, window_bounds = array<i64: 32, 1>}, {pipeline_mode = #tpu.pipeline_mode<synchronous>, transform_indices = @transform_9, window_bounds = array<i64: 80, 32>}, {pipeline_mode = #tpu.pipeline_mode<synchronous>, transform_indices = @transform_10, window_bounds = array<i64: 80, 1>}, {transform_indices = @transform_11, window_bounds = array<i64: 1, 128>}]} {
    %c0 = arith.constant 0 : index
    %c0_0 = arith.constant 0 : index
    %0 = vector.load %arg1[%c0, %c0_0] : memref<16x128xf32, #tpu.memory_space<vmem>>, vector<16x128xf32>
    %c0_1 = arith.constant 0 : index
    %c0_2 = arith.constant 0 : index
    %1 = vector.load %arg4[%c0_1, %c0_2] : memref<32x16xf32, #tpu.memory_space<vmem>>, vector<32x16xf32>
    %cst = arith.constant dense<0.000000e+00> : vector<32x128xf32>
    %2 = tpu.matmul %1, %0, %cst {dimension_numbers = #tpu.dot_dimension_numbers<[1], [0], [0], [1], [0, 0, 1, 1], [], []>} : vector<32x16xf32>, vector<16x128xf32>, vector<32x128xf32> -> vector<32x128xf32>
    %c0_3 = arith.constant 0 : index
    %c0_4 = arith.constant 0 : index
    %3 = vector.load %arg5[%c0_3, %c0_4] : memref<32x1xf32, #tpu.memory_space<vmem>>, vector<32x1xf32>
    %4 = vector.broadcast %3 : vector<32x1xf32> to vector<32x128xf32>
    %5 = arith.addf %2, %4 : vector<32x128xf32>
    %cst_5 = arith.constant 5.000000e-01 : f32
    %6 = vector.broadcast %cst_5 : f32 to vector<32x128xf32>
    %7 = arith.mulf %6, %5 : vector<32x128xf32>
    %cst_6 = arith.constant 0.707106769 : f32
    %8 = vector.broadcast %cst_6 : f32 to vector<32x128xf32>
    %9 = arith.mulf %5, %8 : vector<32x128xf32>
    %cst_7 = arith.constant 0.000000e+00 : f32
    %10 = vector.broadcast %cst_7 : f32 to vector<32x128xf32>
    %11 = arith.cmpf oge, %9, %10 : vector<32x128xf32>
    %cst_8 = arith.constant 1.000000e+00 : f32
    %cst_9 = arith.constant -1.000000e+00 : f32
    %12 = vector.broadcast %cst_8 : f32 to vector<32x128xf32>
    %13 = vector.broadcast %cst_9 : f32 to vector<32x128xf32>
    %14 = arith.select %11, %12, %13 : vector<32x128xi1>, vector<32x128xf32>
    %15 = math.absf %9 : vector<32x128xf32>
    %cst_10 = arith.constant 0.327591091 : f32
    %16 = vector.broadcast %cst_10 : f32 to vector<32x128xf32>
    %17 = arith.mulf %16, %15 : vector<32x128xf32>
    %cst_11 = arith.constant 1.000000e+00 : f32
    %18 = vector.broadcast %cst_11 : f32 to vector<32x128xf32>
    %19 = arith.addf %18, %17 : vector<32x128xf32>
    %cst_12 = arith.constant 1.000000e+00 : f32
    %20 = vector.broadcast %cst_12 : f32 to vector<32x128xf32>
    %21 = arith.divf %20, %19 : vector<32x128xf32>
    %cst_13 = arith.constant 1.06140542 : f32
    %22 = vector.broadcast %cst_13 : f32 to vector<32x128xf32>
    %23 = arith.mulf %22, %21 : vector<32x128xf32>
    %cst_14 = arith.constant -1.45315206 : f32
    %24 = vector.broadcast %cst_14 : f32 to vector<32x128xf32>
    %25 = arith.addf %23, %24 : vector<32x128xf32>
    %26 = arith.mulf %25, %21 : vector<32x128xf32>
    %cst_15 = arith.constant 1.42141378 : f32
    %27 = vector.broadcast %cst_15 : f32 to vector<32x128xf32>
    %28 = arith.addf %26, %27 : vector<32x128xf32>
    %29 = arith.mulf %28, %21 : vector<32x128xf32>
    %cst_16 = arith.constant -0.284496725 : f32
    %30 = vector.broadcast %cst_16 : f32 to vector<32x128xf32>
    %31 = arith.addf %29, %30 : vector<32x128xf32>
    %32 = arith.mulf %31, %21 : vector<32x128xf32>
    %cst_17 = arith.constant 0.254829586 : f32
    %33 = vector.broadcast %cst_17 : f32 to vector<32x128xf32>
    %34 = arith.addf %32, %33 : vector<32x128xf32>
    %35 = arith.mulf %34, %21 : vector<32x128xf32>
    %cst_18 = arith.constant 0.000000e+00 : f32
    %36 = vector.broadcast %cst_18 : f32 to vector<32x128xf32>
    %37 = arith.subf %36, %15 : vector<32x128xf32>
    %38 = arith.mulf %37, %15 : vector<32x128xf32>
    %39 = math.exp %38 : vector<32x128xf32>
    %40 = arith.mulf %35, %39 : vector<32x128xf32>
    %cst_19 = arith.constant 1.000000e+00 : f32
    %41 = vector.broadcast %cst_19 : f32 to vector<32x128xf32>
    %42 = arith.subf %41, %40 : vector<32x128xf32>
    %43 = arith.mulf %14, %42 : vector<32x128xf32>
    %cst_20 = arith.constant 1.000000e+00 : f32
    %44 = vector.broadcast %cst_20 : f32 to vector<32x128xf32>
    %45 = arith.addf %44, %43 : vector<32x128xf32>
    %46 = arith.mulf %7, %45 : vector<32x128xf32>
    %c0_21 = arith.constant 0 : index
    %c0_22 = arith.constant 0 : index
    %47 = vector.load %arg6[%c0_21, %c0_22] : memref<32x32xf32, #tpu.memory_space<vmem>>, vector<32x32xf32>
    %cst_23 = arith.constant dense<0.000000e+00> : vector<32x128xf32>
    %48 = tpu.matmul %47, %46, %cst_23 {dimension_numbers = #tpu.dot_dimension_numbers<[1], [0], [0], [1], [0, 0, 1, 1], [], []>} : vector<32x32xf32>, vector<32x128xf32>, vector<32x128xf32> -> vector<32x128xf32>
    %c0_24 = arith.constant 0 : index
    %c0_25 = arith.constant 0 : index
    %49 = vector.load %arg7[%c0_24, %c0_25] : memref<32x1xf32, #tpu.memory_space<vmem>>, vector<32x1xf32>
    %50 = vector.broadcast %49 : vector<32x1xf32> to vector<32x128xf32>
    %51 = arith.addf %48, %50 : vector<32x128xf32>
    %cst_26 = arith.constant 5.000000e-01 : f32
    %52 = vector.broadcast %cst_26 : f32 to vector<32x128xf32>
    %53 = arith.mulf %52, %51 : vector<32x128xf32>
    %cst_27 = arith.constant 0.707106769 : f32
    %54 = vector.broadcast %cst_27 : f32 to vector<32x128xf32>
    %55 = arith.mulf %51, %54 : vector<32x128xf32>
    %cst_28 = arith.constant 0.000000e+00 : f32
    %56 = vector.broadcast %cst_28 : f32 to vector<32x128xf32>
    %57 = arith.cmpf oge, %55, %56 : vector<32x128xf32>
    %cst_29 = arith.constant 1.000000e+00 : f32
    %cst_30 = arith.constant -1.000000e+00 : f32
    %58 = vector.broadcast %cst_29 : f32 to vector<32x128xf32>
    %59 = vector.broadcast %cst_30 : f32 to vector<32x128xf32>
    %60 = arith.select %57, %58, %59 : vector<32x128xi1>, vector<32x128xf32>
    %61 = math.absf %55 : vector<32x128xf32>
    %cst_31 = arith.constant 0.327591091 : f32
    %62 = vector.broadcast %cst_31 : f32 to vector<32x128xf32>
    %63 = arith.mulf %62, %61 : vector<32x128xf32>
    %cst_32 = arith.constant 1.000000e+00 : f32
    %64 = vector.broadcast %cst_32 : f32 to vector<32x128xf32>
    %65 = arith.addf %64, %63 : vector<32x128xf32>
    %cst_33 = arith.constant 1.000000e+00 : f32
    %66 = vector.broadcast %cst_33 : f32 to vector<32x128xf32>
    %67 = arith.divf %66, %65 : vector<32x128xf32>
    %cst_34 = arith.constant 1.06140542 : f32
    %68 = vector.broadcast %cst_34 : f32 to vector<32x128xf32>
    %69 = arith.mulf %68, %67 : vector<32x128xf32>
    %cst_35 = arith.constant -1.45315206 : f32
    %70 = vector.broadcast %cst_35 : f32 to vector<32x128xf32>
    %71 = arith.addf %69, %70 : vector<32x128xf32>
    %72 = arith.mulf %71, %67 : vector<32x128xf32>
    %cst_36 = arith.constant 1.42141378 : f32
    %73 = vector.broadcast %cst_36 : f32 to vector<32x128xf32>
    %74 = arith.addf %72, %73 : vector<32x128xf32>
    %75 = arith.mulf %74, %67 : vector<32x128xf32>
    %cst_37 = arith.constant -0.284496725 : f32
    %76 = vector.broadcast %cst_37 : f32 to vector<32x128xf32>
    %77 = arith.addf %75, %76 : vector<32x128xf32>
    %78 = arith.mulf %77, %67 : vector<32x128xf32>
    %cst_38 = arith.constant 0.254829586 : f32
    %79 = vector.broadcast %cst_38 : f32 to vector<32x128xf32>
    %80 = arith.addf %78, %79 : vector<32x128xf32>
    %81 = arith.mulf %80, %67 : vector<32x128xf32>
    %cst_39 = arith.constant 0.000000e+00 : f32
    %82 = vector.broadcast %cst_39 : f32 to vector<32x128xf32>
    %83 = arith.subf %82, %61 : vector<32x128xf32>
    %84 = arith.mulf %83, %61 : vector<32x128xf32>
    %85 = math.exp %84 : vector<32x128xf32>
    %86 = arith.mulf %81, %85 : vector<32x128xf32>
    %cst_40 = arith.constant 1.000000e+00 : f32
    %87 = vector.broadcast %cst_40 : f32 to vector<32x128xf32>
    %88 = arith.subf %87, %86 : vector<32x128xf32>
    %89 = arith.mulf %60, %88 : vector<32x128xf32>
    %cst_41 = arith.constant 1.000000e+00 : f32
    %90 = vector.broadcast %cst_41 : f32 to vector<32x128xf32>
    %91 = arith.addf %90, %89 : vector<32x128xf32>
    %92 = arith.mulf %53, %91 : vector<32x128xf32>
    %cst_42 = arith.constant dense<0.000000e+00> : vector<128xf32>
    %93 = vector.multi_reduction <add>, %92, %cst_42 [0] : vector<32x128xf32> to vector<128xf32>
    %94 = vector.shape_cast %93 : vector<128xf32> to vector<1x128xf32>
    %cst_43 = arith.constant 3.200000e+01 : f32
    %95 = vector.broadcast %cst_43 : f32 to vector<1x128xf32>
    %96 = arith.divf %94, %95 : vector<1x128xf32>
    %97 = vector.broadcast %96 : vector<1x128xf32> to vector<32x128xf32>
    %98 = arith.subf %92, %97 : vector<32x128xf32>
    %99 = vector.broadcast %96 : vector<1x128xf32> to vector<32x128xf32>
    %100 = arith.subf %92, %99 : vector<32x128xf32>
    %101 = arith.mulf %98, %100 : vector<32x128xf32>
    %cst_44 = arith.constant dense<0.000000e+00> : vector<128xf32>
    %102 = vector.multi_reduction <add>, %101, %cst_44 [0] : vector<32x128xf32> to vector<128xf32>
    %103 = vector.shape_cast %102 : vector<128xf32> to vector<1x128xf32>
    %cst_45 = arith.constant 3.200000e+01 : f32
    %104 = vector.broadcast %cst_45 : f32 to vector<1x128xf32>
    %105 = arith.divf %103, %104 : vector<1x128xf32>
    %106 = vector.broadcast %96 : vector<1x128xf32> to vector<32x128xf32>
    %107 = arith.subf %92, %106 : vector<32x128xf32>
    %cst_46 = arith.constant 9.99999974E-6 : f32
    %108 = vector.broadcast %cst_46 : f32 to vector<1x128xf32>
    %109 = arith.addf %105, %108 : vector<1x128xf32>
    %110 = math.rsqrt %109 : vector<1x128xf32>
    %111 = vector.broadcast %110 : vector<1x128xf32> to vector<32x128xf32>
    %112 = arith.mulf %107, %111 : vector<32x128xf32>
    %c0_47 = arith.constant 0 : index
    %c0_48 = arith.constant 0 : index
    %113 = vector.load %arg8[%c0_47, %c0_48] : memref<32x1xf32, #tpu.memory_space<vmem>>, vector<32x1xf32>
    %114 = vector.broadcast %113 : vector<32x1xf32> to vector<32x128xf32>
    %115 = arith.mulf %112, %114 : vector<32x128xf32>
    %c0_49 = arith.constant 0 : index
    %c0_50 = arith.constant 0 : index
    %116 = vector.load %arg9[%c0_49, %c0_50] : memref<32x1xf32, #tpu.memory_space<vmem>>, vector<32x1xf32>
    %117 = vector.broadcast %116 : vector<32x1xf32> to vector<32x128xf32>
    %118 = arith.addf %115, %117 : vector<32x128xf32>
    %c0_51 = arith.constant 0 : index
    %c0_52 = arith.constant 0 : index
    %119 = vector.load %arg10[%c0_51, %c0_52] : memref<80x32xf32, #tpu.memory_space<vmem>>, vector<80x32xf32>
    %cst_53 = arith.constant dense<0.000000e+00> : vector<80x128xf32>
    %120 = tpu.matmul %119, %118, %cst_53 {dimension_numbers = #tpu.dot_dimension_numbers<[1], [0], [0], [1], [0, 0, 1, 1], [], []>} : vector<80x32xf32>, vector<32x128xf32>, vector<80x128xf32> -> vector<80x128xf32>
    %c0_54 = arith.constant 0 : index
    %c0_55 = arith.constant 0 : index
    %121 = vector.load %arg11[%c0_54, %c0_55] : memref<80x1xf32, #tpu.memory_space<vmem>>, vector<80x1xf32>
    %122 = vector.broadcast %121 : vector<80x1xf32> to vector<80x128xf32>
    %123 = arith.addf %120, %122 : vector<80x128xf32>
    %124 = vector.extract_strided_slice %123 {offsets = [0, 0], sizes = [32, 128], strides = [1, 1]} : vector<80x128xf32> to vector<32x128xf32>
    %125 = vector.extract_strided_slice %123 {offsets = [32, 0], sizes = [32, 128], strides = [1, 1]} : vector<80x128xf32> to vector<32x128xf32>
    %126 = vector.extract_strided_slice %123 {offsets = [64, 0], sizes = [4, 128], strides = [1, 1]} : vector<80x128xf32> to vector<4x128xf32>
    %127 = vector.extract_strided_slice %123 {offsets = [72, 0], sizes = [4, 128], strides = [1, 1]} : vector<80x128xf32> to vector<4x128xf32>
    %c0_56 = arith.constant 0 : index
    %c0_57 = arith.constant 0 : index
    %128 = vector.load %arg2[%c0_56, %c0_57] : memref<8x128xf32, #tpu.memory_space<vmem>>, vector<8x128xf32>
    %129 = tpu.concatenate %128, %128, %128, %128 in 0 : vector<8x128xf32>, vector<8x128xf32>, vector<8x128xf32>, vector<8x128xf32> -> vector<32x128xf32>
    %130 = arith.subf %129, %124 : vector<32x128xf32>
    %cst_58 = arith.constant 0.000000e+00 : f32
    %131 = vector.broadcast %cst_58 : f32 to vector<32x128xf32>
    %132 = arith.subf %131, %125 : vector<32x128xf32>
    %133 = math.exp %132 : vector<32x128xf32>
    %134 = arith.mulf %130, %133 : vector<32x128xf32>
    %c0_59 = arith.constant 0 : index
    %c0_60 = arith.constant 0 : index
    %135 = vector.load %arg3[%c0_59, %c0_60] : memref<4x32xf32, #tpu.memory_space<vmem>>, vector<4x32xf32>
    %136 = arith.mulf %134, %134 : vector<32x128xf32>
    %cst_61 = arith.constant dense<0.000000e+00> : vector<4x128xf32>
    %137 = tpu.matmul %135, %136, %cst_61 {dimension_numbers = #tpu.dot_dimension_numbers<[1], [0], [0], [1], [0, 0, 1, 1], [], []>} : vector<4x32xf32>, vector<32x128xf32>, vector<4x128xf32> -> vector<4x128xf32>
    %cst_62 = arith.constant dense<0xFF800000> : vector<128xf32>
    %138 = vector.multi_reduction <maximumf>, %126, %cst_62 [0] : vector<4x128xf32> to vector<128xf32>
    %139 = vector.shape_cast %138 : vector<128xf32> to vector<1x128xf32>
    %140 = vector.broadcast %139 : vector<1x128xf32> to vector<4x128xf32>
    %141 = arith.subf %126, %140 : vector<4x128xf32>
    %142 = vector.broadcast %139 : vector<1x128xf32> to vector<4x128xf32>
    %143 = arith.subf %126, %142 : vector<4x128xf32>
    %144 = math.exp %143 : vector<4x128xf32>
    %cst_63 = arith.constant dense<0.000000e+00> : vector<128xf32>
    %145 = vector.multi_reduction <add>, %144, %cst_63 [0] : vector<4x128xf32> to vector<128xf32>
    %146 = vector.shape_cast %145 : vector<128xf32> to vector<1x128xf32>
    %147 = math.log %146 : vector<1x128xf32>
    %148 = vector.broadcast %147 : vector<1x128xf32> to vector<4x128xf32>
    %149 = arith.subf %141, %148 : vector<4x128xf32>
    %cst_64 = arith.constant -7.35150814 : f32
    %150 = vector.broadcast %cst_64 : f32 to vector<4x128xf32>
    %151 = arith.addf %150, %149 : vector<4x128xf32>
    %cst_65 = arith.constant 5.000000e-01 : f32
    %152 = vector.broadcast %cst_65 : f32 to vector<4x128xf32>
    %153 = arith.mulf %152, %137 : vector<4x128xf32>
    %154 = arith.subf %151, %153 : vector<4x128xf32>
    %155 = arith.subf %154, %127 : vector<4x128xf32>
    %cst_66 = arith.constant dense<0xFF800000> : vector<128xf32>
    %156 = vector.multi_reduction <maximumf>, %155, %cst_66 [0] : vector<4x128xf32> to vector<128xf32>
    %157 = vector.shape_cast %156 : vector<128xf32> to vector<1x128xf32>
    %158 = vector.broadcast %157 : vector<1x128xf32> to vector<4x128xf32>
    %159 = arith.subf %155, %158 : vector<4x128xf32>
    %160 = math.exp %159 : vector<4x128xf32>
    %cst_67 = arith.constant dense<0.000000e+00> : vector<128xf32>
    %161 = vector.multi_reduction <add>, %160, %cst_67 [0] : vector<4x128xf32> to vector<128xf32>
    %162 = vector.shape_cast %161 : vector<128xf32> to vector<1x128xf32>
    %163 = math.log %162 : vector<1x128xf32>
    %164 = arith.addf %157, %163 : vector<1x128xf32>
    %c0_68 = arith.constant 0 : index
    %c0_69 = arith.constant 0 : index
    %165 = vector.load %arg12[%c0_68, %c0_69] : memref<1x128xf32, #tpu.memory_space<vmem>>, vector<1x128xf32>
    tpu.vector_store %arg12[%c0_68, %c0_69], %164 {strides = array<i32>} : memref<1x128xf32, #tpu.memory_space<vmem>>, vector<1x128xf32>,
    return
  }
  func.func @transform_0(%arg0: i32) -> (i32, i32) {
    %c0_i32 = arith.constant 0 : i32
    %c0_i32_0 = arith.constant 0 : i32
    return %c0_i32, %arg0 : i32, i32
  }
  func.func @transform_1(%arg0: i32) -> (i32, i32) {
    %c0_i32 = arith.constant 0 : i32
    %c0_i32_0 = arith.constant 0 : i32
    return %c0_i32, %arg0 : i32, i32
  }
  func.func @transform_2(%arg0: i32) -> (i32, i32) {
    %c0_i32 = arith.constant 0 : i32
    %c0_i32_0 = arith.constant 0 : i32
    %c0_i32_1 = arith.constant 0 : i32
    return %c0_i32, %c0_i32_0 : i32, i32
  }
  func.func @transform_3(%arg0: i32) -> (i32, i32) {
    %c0_i32 = arith.constant 0 : i32
    %c0_i32_0 = arith.constant 0 : i32
    %c0_i32_1 = arith.constant 0 : i32
    return %c0_i32, %c0_i32_0 : i32, i32
  }
  func.func @transform_4(%arg0: i32) -> (i32, i32) {
    %c0_i32 = arith.constant 0 : i32
    %c0_i32_0 = arith.constant 0 : i32
    %c0_i32_1 = arith.constant 0 : i32
    return %c0_i32, %c0_i32_0 : i32, i32
  }
  func.func @transform_5(%arg0: i32) -> (i32, i32) {
    %c0_i32 = arith.constant 0 : i32
    %c0_i32_0 = arith.constant 0 : i32
    %c0_i32_1 = arith.constant 0 : i32
    return %c0_i32, %c0_i32_0 : i32, i32
  }
  func.func @transform_6(%arg0: i32) -> (i32, i32) {
    %c0_i32 = arith.constant 0 : i32
    %c0_i32_0 = arith.constant 0 : i32
    %c0_i32_1 = arith.constant 0 : i32
    return %c0_i32, %c0_i32_0 : i32, i32
  }
  func.func @transform_7(%arg0: i32) -> (i32, i32) {
    %c0_i32 = arith.constant 0 : i32
    %c0_i32_0 = arith.constant 0 : i32
    %c0_i32_1 = arith.constant 0 : i32
    return %c0_i32, %c0_i32_0 : i32, i32
  }
  func.func @transform_8(%arg0: i32) -> (i32, i32) {
    %c0_i32 = arith.constant 0 : i32
    %c0_i32_0 = arith.constant 0 : i32
    %c0_i32_1 = arith.constant 0 : i32
    return %c0_i32, %c0_i32_0 : i32, i32
  }
  func.func @transform_9(%arg0: i32) -> (i32, i32) {
    %c0_i32 = arith.constant 0 : i32
    %c0_i32_0 = arith.constant 0 : i32
    %c0_i32_1 = arith.constant 0 : i32
    return %c0_i32, %c0_i32_0 : i32, i32
  }
  func.func @transform_10(%arg0: i32) -> (i32, i32) {
    %c0_i32 = arith.constant 0 : i32
    %c0_i32_0 = arith.constant 0 : i32
    %c0_i32_1 = arith.constant 0 : i32
    return %c0_i32, %c0_i32_0 : i32, i32
  }
  func.func @transform_11(%arg0: i32) -> (i32, i32) {
    %c0_i32 = arith.constant 0 : i32
    %c0_i32_0 = arith.constant 0 : i32
    return %c0_i32, %arg0 : i32, i32
  }
}

</mosaic_0001>

<bundles_post_ra>
// kernel: tpu_custom_call.1
= control target key start
LH: loop header
LB: loop body
LE: loop exit
PB: predicated region body
PF: predicated region fallthrough
CT: control target
= control target key end

     0   :  { %vm69_vm0 = vcmask 130048   ;;  %v1192_v4 = vmov 0   ;;  %s1512_s0 = inlined_call_operand.vmem [shape: f32[16,128], index: 0, kind: input, shape index: {}]   ;;  %s1513_s1 = inlined_call_operand.vmem [shape: f32[8,128], index: 1, kind: input, shape index: {}]   ;;  %s1514_s2 = inlined_call_operand.vmem [shape: f32[4,32], index: 2, kind: input, shape index: {}]   ;;  %s1515_s3 = inlined_call_operand.vmem [shape: f32[32,16], index: 3, kind: input, shape index: {}]   ;;  %s1516_s4 = inlined_call_operand.vmem [shape: f32[32,1], index: 4, kind: input, shape index: {}]   ;;  %s1517_s5 = inlined_call_operand.vmem [shape: f32[32,32], index: 5, kind: input, shape index: {}]   ;;  %s1518_s6 = inlined_call_operand.vmem [shape: f32[32,1], index: 6, kind: input, shape index: {}]   ;;  %s1519_s7 = inlined_call_operand.vmem [shape: f32[32,1], index: 7, kind: input, shape index: {}]   ;;  %s1520_s8 = inlined_call_operand.vmem [shape: f32[32,1], index: 8, kind: input, shape index: {}]   ;;  %s1521_s9 = inlined_call_operand.vmem [shape: f32[80,32], index: 9, kind: input, shape index: {}]   ;;  %s1522_s10 = inlined_call_operand.vmem [shape: f32[80,1], index: 10, kind: input, shape index: {}]   ;;  %s1523_s11 = inlined_call_operand.hbm [shape: f32[1,128], index: 11, kind: output, shape index: {}]  }
   0x1   :  { %v39_v0 = vld [vmem:[%s1512_s0] sm:$0xff]  ;;  %v40_v1 = vld [vmem:[%s1512_s0 + $0x8] sm:$0xff]  ;;  %1116 = vset.pattern.permute.xlu0 %v1192_v4  ;;  %1117 = vset.pattern.permute.xlu1 %v1192_v4  ;;  %v47_v6 = vld [vmem:[%s1516_s4 + $0x10] sm:$0xff] }
   0x2   :  { %v41_v2 = vld [vmem:[%s1515_s3] sm:$0xff]  ;;  %v1084_v3 = vpack.c.bf16 %v40_v1, %v39_v0  ;;  %v42_v7 = vld [vmem:[%s1515_s3 + $0x8] sm:$0xff]  ;;  %61 = vperm.xlu1 %1117, %v47_v6   ;;  %v43_v9 = vld [vmem:[%s1515_s3 + $0x10] sm:$0xff] }
   0x3   :  { %1030 = vmatprep.mubr.msk.f32.mxu1 %vm69_vm0, %v41_v2  ;;  %v45_v5 = vld [vmem:[%s1516_s4] sm:$0xff]  ;;  %v46_v8 = vld [vmem:[%s1516_s4 + $0x8] sm:$0xff]  ;;  %v48_v10 = vld [vmem:[%s1516_s4 + $0x18] sm:$0xff] }
   0x4   :  { %1085 = vmatprep.subr.bf16.mxu1 %v1084_v3  ;;  %51 = vperm.xlu0 %1116, %v45_v5   ;;  %v44_v11 = vld [vmem:[%s1515_s3 + $0x18] sm:$0xff]  ;;  %v279_v12 = vld [vmem:[%s1518_s6] sm:$0xff]  ;;  %v280_v13 = vld [vmem:[%s1518_s6 + $0x8] sm:$0xff] }
   0x5   :  { %1087 = vmatpush3.bf16.msra.mxu1 %v1084_v3 }
   0x6   :  { %66 = vperm.xlu1 %1117, %v48_v10  }
   0x8   :  { %1031 = vmatmul.mubr.msk.f32.vlgmr.msra.gmra.mrb[0].mxu1 %vm69_vm0, %v42_v7  ;;  %56 = vperm.xlu0 %1116, %v46_v8  }
   0x9   :  { %1033 = vmatprep.mubr.msk.f32.mxu1 %vm69_vm0, %v43_v9 }
   0xa   :  { %16 = vsyncpa [#allocation3], 0  ;;  %290 = vperm.xlu1 %1117, %v280_v13   ;;  %v281_v14 = vld [vmem:[%s1518_s6 + $0x10] sm:$0xff]  ;;  %v282_v15 = vld [vmem:[%s1518_s6 + $0x18] sm:$0xff]  ;;  %vm303_vm1 = vcmask 261120   ;;  %vm1195_vm10 = vmmov 0  }
   0xb   :  { %v544_v16 = vld [vmem:[%s1519_s7] sm:$0xff]  ;;  %v545_v17 = vld [vmem:[%s1519_s7 + $0x8] sm:$0xff]  ;;  %v546_v20 = vld [vmem:[%s1519_s7 + $0x10] sm:$0xff]  ;;  %vm914_vm11 = vcmask 1043456  }
   0xc   :  { %1034 = vmatmul.mubr.msk.f32.gmra.mrb[2].mxu1 %vm69_vm0, %v44_v11  ;;  %285 = vperm.xlu0 %1116, %v279_v12   ;;  %v572_v18 = vld [vmem:[%s1520_s8] sm:$0xff]  ;;  %v573_v19 = vld [vmem:[%s1520_s8 + $0x8] sm:$0xff]  ;;  %v547_v21 = vld [vmem:[%s1519_s7 + $0x18] sm:$0xff] }
   0xd   :  { %v574_v22 = vld [vmem:[%s1520_s8 + $0x10] sm:$0xff]  ;;  %v575_v23 = vld [vmem:[%s1520_s8 + $0x18] sm:$0xff]  ;;  %v614_v24 = vld [vmem:[%s1522_s10 + $0x20] sm:$0xff] }
   0xe   :  { %300 = vperm.xlu1 %1117, %v282_v15   ;;  %v615_v25 = vld [vmem:[%s1522_s10 + $0x28] sm:$0xff]  ;;  %v616_v26 = vld [vmem:[%s1522_s10 + $0x30] sm:$0xff]  ;;  %v617_v27 = vld [vmem:[%s1522_s10 + $0x38] sm:$0xff] }
   0xf   :  { %v610_v28 = vld [vmem:[%s1522_s10] sm:$0xff]  ;;  %v611_v29 = vld [vmem:[%s1522_s10 + $0x8] sm:$0xff]  ;;  %v612_v30 = vld [vmem:[%s1522_s10 + $0x10] sm:$0xff] }
  0x10   :  { %295 = vperm.xlu0 %1116, %v281_v14   ;;  %v613_v31 = vld [vmem:[%s1522_s10 + $0x18] sm:$0xff]  ;;  %v618_v32 = vld [vmem:[%s1522_s10 + $0x40] sm:$0xff]  ;;  %v619_v33 = vld [vmem:[%s1522_s10 + $0x48] sm:$0xff] }
  0x11   :  { %v275_v34 = vld [vmem:[%s1517_s5] sm:$0xff] }
  0x12   :  { %555 = vperm.xlu1 %1117, %v545_v17   ;;  %1044 = vmatprep.mubr.msk.f32.mxu1 %vm303_vm1, %v275_v34 }
  0x14   :  { %550 = vperm.xlu0 %1116, %v544_v16  }
  0x16   :  { %583 = vperm.xlu1 %1117, %v573_v19  }
  0x18   :  { %578 = vperm.xlu0 %1116, %v572_v18  }
  0x1a   :  { %565 = vperm.xlu1 %1117, %v547_v21  }
  0x1c   :  { %560 = vperm.xlu0 %1116, %v546_v20  }
  0x1e   :  { %593 = vperm.xlu1 %1117, %v575_v23  }
  0x20   :  { %588 = vperm.xlu0 %1116, %v574_v22  }
  0x22   :  { %647 = vperm.xlu1 %1117, %v615_v25  }
  0x24   :  { %642 = vperm.xlu0 %1116, %v614_v24  }
  0x26   :  { %657 = vperm.xlu1 %1117, %v617_v27  }
  0x28   :  { %652 = vperm.xlu0 %1116, %v616_v26  }
  0x2a   :  { %627 = vperm.xlu1 %1117, %v611_v29  }
  0x2c   :  { %622 = vperm.xlu0 %1116, %v610_v28  }
  0x2e   :  { %637 = vperm.xlu1 %1117, %v613_v31  }
  0x30   :  { %632 = vperm.xlu0 %1116, %v612_v30  }
  0x32   :  { %667 = vperm.xlu1 %1117, %v619_v33  }
  0x34   :  { %662 = vperm.xlu0 %1116, %v618_v32  }
  0x81   :  { %v62_v36 = vpop.permute.xlu1 %61 }
  0x83   :  { %v52_v35 = vpop.permute.xlu0 %51 }
  0x85   :  { %v67_v43 = vpop.permute.xlu1 %66 }
  0x87   :  { %v57_v37 = vpop.permute.xlu0 %56 }
  0xdb   :  { %v1032_v38 = vpop.f32.mrb[0].mxu1 }
  0xdc   :  { %v1362_v39 = vadd.f32 %v1032_v38, %v57_v37  ;;  %v148_v40 = vpop.f32.mrb[1].mxu1 }
  0xdd   :  { %v1364_v41 = vadd.f32 %v148_v40, %v52_v35 }
  0xde   :  { %v1367_v42 = vmul.f32 0.70710677, %v1362_v39 }
  0xdf   :  { %v1370_v44 = vmul.f32 0.70710677, %v1364_v41  ;;  %v1035_v45 = vpop.f32.mrb[2].mxu1 }
  0xe0   :  { %v184_v46 = vand.u32 2147483647, %v1367_v42  ;;  %v1373_v47 = vadd.f32 %v1035_v45, %v67_v43  ;;  %v158_v48 = vpop.f32.mrb[3].mxu1  ;;  %vm176_vm2 = vcmp.ge.f32.partialorder %v1367_v42, 0.0 }
  0xe1   :  { %v183_v49 = vand.u32 2147483647, %v1370_v44  ;;  %v1376_v50 = vadd.f32 %v158_v48, %v62_v36  ;;  %vm175_vm3 = vcmp.ge.f32.partialorder %v1370_v44, 0.0  ;;  %v168_v44 = vmul.f32 0.5, %v1362_v39 }
  0xe2   :  { %v188_v51 = vmul.f32 0.3275911, %v184_v46  ;;  %v1379_v53 = vmul.f32 0.70710677, %v1373_v47  ;;  %v240_v62 = vsub.f32 0.0, %v184_v46 }
  0xe3   :  { %v187_v52 = vmul.f32 0.3275911, %v183_v49  ;;  %v1382_v55 = vmul.f32 0.70710677, %v1376_v50  ;;  %v239_v0 = vsub.f32 0.0, %v183_v49 }
  0xe4   :  { %v192_v54 = vadd.f32 1.0, %v188_v51  ;;  %v186_v57 = vand.u32 2147483647, %v1379_v53  ;;  %v244_v2 = vmul.f32 %v240_v62, %v184_v46  ;;  %vm178_vm4 = vcmp.ge.f32.partialorder %v1379_v53, 0.0 }
  0xe5   :  { %v191_v56 = vadd.f32 1.0, %v187_v52  ;;  %v185_v59 = vand.u32 2147483647, %v1382_v55  ;;  %v243_v5 = vmul.f32 %v239_v0, %v183_v49  ;;  %vm177_vm5 = vcmp.ge.f32.partialorder %v1382_v55, 0.0  ;;  %v276_v55 = vld [vmem:[%s1517_s5 + $0x8] sm:$0xff] }
  0xe6   :  { %1118 = vrcp.f32 %v192_v54  ;;  %v190_v58 = vmul.f32 0.3275911, %v186_v57  ;;  %v242_v6 = vsub.f32 0.0, %v186_v57  ;;  %v249_v9 = vmul.f32 1.442695, %v244_v2 }
  0xe7   :  { %1120 = vrcp.f32 %v191_v56  ;;  %v189_v61 = vmul.f32 0.3275911, %v185_v59  ;;  %v241_v11 = vsub.f32 0.0, %v185_v59  ;;  %v247_v14 = vmul.f32 1.442695, %v243_v5 }
  0xe8   :  { %v194_v60 = vadd.f32 1.0, %v190_v58  ;;  %v246_v15 = vmul.f32 %v242_v6, %v186_v57 }
  0xe9   :  { %v193_v63 = vadd.f32 1.0, %v189_v61  ;;  %v245_v22 = vmul.f32 %v241_v11, %v185_v59  ;;  %v1193_v61 = vmov -1.0  }
  0xea   :  { %1122 = vrcp.f32 %v194_v60  ;;  %v253_v24 = vmul.f32 1.442695, %v246_v15  ;;  %v180_v62 = vsel %vm176_vm2, 1.0, %v1193_v61 }
  0xeb   :  { %1124 = vrcp.f32 %v193_v63  ;;  %v251_v32 = vmul.f32 1.442695, %v245_v22 }
  0xec   :  { %1126 = vpow2.f32 %v249_v9  ;;  %v167_v9 = vmul.f32 0.5, %v1364_v41 }
  0xed   :  { %1128 = vpow2.f32 %v247_v14 }
  0xee   :  { %1130 = vpow2.f32 %v253_v24 }
  0xef   :  { %1132 = vpow2.f32 %v251_v32 }
  0xf0   :  { %v1119_v1 = vpop.eup %1118 }
  0xf1   :  { %v1121_v3 = vpop.eup %1120  ;;  %v204_v4 = vmul.f32 1.0614054, %v1119_v1 }
  0xf2   :  { %v203_v7 = vmul.f32 1.0614054, %v1121_v3 }
  0xf3   :  { %v208_v8 = vadd.f32 -1.4531521, %v204_v4 }
  0xf4   :  { %v207_v10 = vadd.f32 -1.4531521, %v203_v7  ;;  %v1123_v12 = vpop.eup %1122 }
  0xf5   :  { %v212_v13 = vmul.f32 %v1119_v1, %v208_v8  ;;  %v206_v17 = vmul.f32 1.0614054, %v1123_v12  ;;  %v1125_v19 = vpop.eup %1124 }
  0xf6   :  { %v211_v16 = vmul.f32 %v1121_v3, %v207_v10  ;;  %v205_v25 = vmul.f32 1.0614054, %v1125_v19  ;;  %v1127_v48 = vpop.eup %1126 }
  0xf7   :  { %v216_v18 = vadd.f32 1.4214138, %v212_v13  ;;  %v210_v21 = vadd.f32 -1.4531521, %v206_v17  ;;  %v1129_v52 = vpop.eup %1128 }
  0xf8   :  { %v215_v20 = vadd.f32 1.4214138, %v211_v16  ;;  %v209_v29 = vadd.f32 -1.4531521, %v205_v25  ;;  %v277_v25 = vld [vmem:[%s1517_s5 + $0x10] sm:$0xff] }
  0xf9   :  { %v220_v23 = vmul.f32 %v1119_v1, %v216_v18  ;;  %v214_v27 = vmul.f32 %v1123_v12, %v210_v21  ;;  %v181_v18 = vsel %vm177_vm5, 1.0, %v1193_v61  ;;  %v169_v21 = vmul.f32 0.5, %v1376_v50  ;;  %v291_v50 = vpop.permute.xlu1 %290 }
  0xfa   :  { %v219_v26 = vmul.f32 %v1121_v3, %v215_v20  ;;  %v213_v34 = vmul.f32 %v1125_v19, %v209_v29 }
  0xfb   :  { %v224_v28 = vadd.f32 -0.28449672, %v220_v23  ;;  %v218_v31 = vadd.f32 1.4214138, %v214_v27  ;;  %v286_v27 = vpop.permute.xlu0 %285 }
  0xfc   :  { %v223_v30 = vadd.f32 -0.28449672, %v219_v26  ;;  %v217_v38 = vadd.f32 1.4214138, %v213_v34  ;;  %v600_v26 = vld [vmem:[%s1521_s9] sm:$0xff] }
  0xfd   :  { %v228_v33 = vmul.f32 %v1119_v1, %v224_v28  ;;  %v222_v36 = vmul.f32 %v1123_v12, %v218_v31  ;;  %1058 = vmatprep.mubr.msk.f32.mxu0 %vm303_vm1, %v600_v26 }
  0xfe   :  { %v227_v35 = vmul.f32 %v1121_v3, %v223_v30  ;;  %v221_v46 = vmul.f32 %v1125_v19, %v217_v38 }
  0xff   :  { %v232_v37 = vadd.f32 0.2548296, %v228_v33  ;;  %v226_v43 = vadd.f32 -0.28449672, %v222_v36  ;;  %v301_v33 = vpop.permute.xlu1 %300  ;;  %v296_v36 = vpop.permute.xlu0 %295 }
 0x100   :  { %v231_v40 = vadd.f32 0.2548296, %v227_v35  ;;  %v225_v56 = vadd.f32 -0.28449672, %v221_v46 }
 0x101   :  { %v236_v45 = vmul.f32 %v1119_v1, %v232_v37  ;;  %v230_v51 = vmul.f32 %v1123_v12, %v226_v43  ;;  %v1131_v1 = vpop.eup %1130 }
 0x102   :  { %v235_v49 = vmul.f32 %v1121_v3, %v231_v40  ;;  %v229_v60 = vmul.f32 %v1125_v19, %v225_v56  ;;  %v179_v3 = vsel %vm175_vm3, 1.0, %v1193_v61  ;;  %v1133_v8 = vpop.eup %1132 }
 0x103   :  { %v256_v54 = vmul.f32 %v1127_v48, %v236_v45  ;;  %v234_v58 = vadd.f32 0.2548296, %v230_v51 }
 0x104   :  { %v255_v57 = vmul.f32 %v1129_v52, %v235_v49  ;;  %v233_v4 = vadd.f32 0.2548296, %v229_v60 }
 0x105   :  { %v260_v59 = vsub.f32 1.0, %v256_v54  ;;  %v238_v0 = vmul.f32 %v1123_v12, %v234_v58  ;;  %v182_v12 = vsel %vm178_vm4, 1.0, %v1193_v61 }
 0x106   :  { %v259_v63 = vsub.f32 1.0, %v255_v57  ;;  %v237_v7 = vmul.f32 %v1125_v19, %v233_v4  ;;  %v170_v19 = vmul.f32 0.5, %v1373_v47  ;;  %v278_v47 = vld [vmem:[%s1517_s5 + $0x18] sm:$0xff] }
 0x107   :  { %v264_v2 = vmul.f32 %v260_v59, %v180_v62  ;;  %v258_v42 = vmul.f32 %v1131_v1, %v238_v0 }
 0x108   :  { %v263_v5 = vmul.f32 %v259_v63, %v179_v3  ;;  %v257_v14 = vmul.f32 %v1133_v8, %v237_v7 }
 0x109   :  { %v268_v6 = vadd.f32 1.0, %v264_v2  ;;  %v262_v11 = vsub.f32 1.0, %v258_v42 }
 0x10a   :  { %v267_v10 = vadd.f32 1.0, %v263_v5  ;;  %v261_v17 = vsub.f32 1.0, %v257_v14 }
 0x10b   :  { %v272_v13 = vmul.f32 %v268_v6, %v168_v44  ;;  %v266_v16 = vmul.f32 %v262_v11, %v182_v12 }
 0x10c   :  { %v271_v15 = vmul.f32 %v267_v10, %v167_v9  ;;  %v265_v20 = vmul.f32 %v261_v17, %v181_v18 }
 0x10d   :  { %v270_v53 = vadd.f32 1.0, %v266_v16 }
 0x10e   :  { %v1088_v39 = vpack.c.bf16 %v272_v13, %v271_v15  ;;  %v269_v22 = vadd.f32 1.0, %v265_v20 }
 0x10f   :  { %v274_v41 = vmul.f32 %v270_v53, %v170_v19 }
 0x110   :  { %1089 = vmatprep.subr.bf16.mxu1 %v1088_v39  ;;  %v273_v23 = vmul.f32 %v269_v22, %v169_v21 }
 0x111   :  { %1091 = vmatpush3.bf16.msra.mxu1 %v1088_v39 }
 0x112   :  { %v1092_v24 = vpack.c.bf16 %v274_v41, %v273_v23 }
 0x114   :  { %1093 = vmatprep.subr.bf16.mxu1 %v1092_v24 }
 0x115   :  { %1095 = vmatpush3.bf16.msra.mxu1 %v1092_v24 }
 0x118   :  { %1045 = vmatmul.mubr.msk.f32.vlgmr.msra.gmra.mrb[4].mxu1 %vm303_vm1, %v276_v55 }
 0x119   :  { %1047 = vmatprep.mubr.msk.f32.mxu1 %vm303_vm1, %v277_v25 }
 0x11c   :  { %1048 = vmatmul.mubr.msk.f32.gmra.mrb[6].mxu1 %vm303_vm1, %v278_v47 }
 0x1eb   :  { %v1046_v28 = vpop.f32.mrb[4].mxu1 }
 0x1ec   :  { %v1414_v29 = vadd.f32 %v1046_v28, %v291_v50  ;;  %v382_v30 = vpop.f32.mrb[5].mxu1 }
 0x1ed   :  { %v1416_v31 = vadd.f32 %v382_v30, %v286_v27 }
 0x1ee   :  { %v1419_v32 = vmul.f32 0.70710677, %v1414_v29 }
 0x1ef   :  { %v1422_v34 = vmul.f32 0.70710677, %v1416_v31  ;;  %v1049_v35 = vpop.f32.mrb[6].mxu1 }
 0x1f0   :  { %v418_v37 = vand.u32 2147483647, %v1419_v32  ;;  %v1425_v38 = vadd.f32 %v1049_v35, %v301_v33  ;;  %v392_v40 = vpop.f32.mrb[7].mxu1  ;;  %vm410_vm6 = vcmp.ge.f32.partialorder %v1419_v32, 0.0  ;;  %v402_v32 = vmul.f32 0.5, %v1414_v29 }
 0x1f1   :  { %v417_v43 = vand.u32 2147483647, %v1422_v34  ;;  %v1428_v45 = vadd.f32 %v392_v40, %v296_v36  ;;  %vm409_vm7 = vcmp.ge.f32.partialorder %v1422_v34, 0.0 }
 0x1f2   :  { %v422_v46 = vmul.f32 0.3275911, %v418_v37  ;;  %v1431_v49 = vmul.f32 0.70710677, %v1425_v38  ;;  %v474_v62 = vsub.f32 0.0, %v418_v37 }
 0x1f3   :  { %v421_v48 = vmul.f32 0.3275911, %v417_v43  ;;  %v1434_v52 = vmul.f32 0.70710677, %v1428_v45  ;;  %v473_v0 = vsub.f32 0.0, %v417_v43 }
 0x1f4   :  { %v426_v51 = vadd.f32 1.0, %v422_v46  ;;  %v420_v56 = vand.u32 2147483647, %v1431_v49  ;;  %v478_v2 = vmul.f32 %v474_v62, %v418_v37  ;;  %v414_v62 = vsel %vm410_vm6, 1.0, %v1193_v61 }
 0x1f5   :  { %v425_v54 = vadd.f32 1.0, %v421_v48  ;;  %v419_v58 = vand.u32 2147483647, %v1434_v52  ;;  %v477_v5 = vmul.f32 %v473_v0, %v417_v43  ;;  %vm412_vm8 = vcmp.ge.f32.partialorder %v1431_v49, 0.0 }
 0x1f6   :  { %1134 = vrcp.f32 %v426_v51  ;;  %v424_v57 = vmul.f32 0.3275911, %v420_v56  ;;  %v476_v42 = vsub.f32 0.0, %v420_v56  ;;  %v483_v7 = vmul.f32 1.442695, %v478_v2 }
 0x1f7   :  { %1136 = vrcp.f32 %v425_v54  ;;  %v423_v60 = vmul.f32 0.3275911, %v419_v58  ;;  %v475_v9 = vsub.f32 0.0, %v419_v58  ;;  %v481_v13 = vmul.f32 1.442695, %v477_v5 }
 0x1f8   :  { %v428_v59 = vadd.f32 1.0, %v424_v57  ;;  %v480_v12 = vmul.f32 %v476_v42, %v420_v56  ;;  %vm411_vm9 = vcmp.ge.f32.partialorder %v1434_v52, 0.0 }
 0x1f9   :  { %v427_v63 = vadd.f32 1.0, %v423_v60  ;;  %v479_v39 = vmul.f32 %v475_v9, %v419_v58  ;;  %v415_v29 = vsel %vm411_vm9, 1.0, %v1193_v61 }
 0x1fa   :  { %1138 = vrcp.f32 %v428_v59  ;;  %v487_v20 = vmul.f32 1.442695, %v480_v12  ;;  %v416_v12 = vsel %vm412_vm8, 1.0, %v1193_v61 }
 0x1fb   :  { %1140 = vrcp.f32 %v427_v63  ;;  %v485_v47 = vmul.f32 1.442695, %v479_v39 }
 0x1fc   :  { %1142 = vpow2.f32 %v483_v7  ;;  %v401_v7 = vmul.f32 0.5, %v1416_v31  ;;  %v404_v31 = vmul.f32 0.5, %v1425_v38 }
 0x1fd   :  { %1144 = vpow2.f32 %v481_v13 }
 0x1fe   :  { %1146 = vpow2.f32 %v487_v20 }
 0x1ff   :  { %1148 = vpow2.f32 %v485_v47 }
 0x200   :  { %v1135_v1 = vpop.eup %1134 }
 0x201   :  { %v1137_v3 = vpop.eup %1136  ;;  %v438_v4 = vmul.f32 1.0614054, %v1135_v1 }
 0x202   :  { %v437_v44 = vmul.f32 1.0614054, %v1137_v3 }
 0x203   :  { %v442_v6 = vadd.f32 -1.4531521, %v438_v4 }
 0x204   :  { %v441_v8 = vadd.f32 -1.4531521, %v437_v44  ;;  %v1139_v10 = vpop.eup %1138 }
 0x205   :  { %v446_v11 = vmul.f32 %v1135_v1, %v442_v6  ;;  %v440_v15 = vmul.f32 1.0614054, %v1139_v10  ;;  %v1141_v17 = vpop.eup %1140 }
 0x206   :  { %v445_v14 = vmul.f32 %v1137_v3, %v441_v8  ;;  %v439_v41 = vmul.f32 1.0614054, %v1141_v17  ;;  %v1143_v43 = vpop.eup %1142 }
 0x207   :  { %v450_v16 = vadd.f32 1.4214138, %v446_v11  ;;  %v444_v18 = vadd.f32 -1.4531521, %v440_v15  ;;  %v1145_v51 = vpop.eup %1144 }
 0x208   :  { %v449_v53 = vadd.f32 1.4214138, %v445_v14  ;;  %v443_v24 = vadd.f32 -1.4531521, %v439_v41 }
 0x209   :  { %v454_v19 = vmul.f32 %v1135_v1, %v450_v16  ;;  %v448_v22 = vmul.f32 %v1139_v10, %v444_v18 }
 0x20a   :  { %v453_v21 = vmul.f32 %v1137_v3, %v449_v53  ;;  %v447_v26 = vmul.f32 %v1141_v17, %v443_v24 }
 0x20b   :  { %v458_v23 = vadd.f32 -0.28449672, %v454_v19  ;;  %v452_v25 = vadd.f32 1.4214138, %v448_v22 }
 0x20c   :  { %v457_v55 = vadd.f32 -0.28449672, %v453_v21  ;;  %v451_v33 = vadd.f32 1.4214138, %v447_v26 }
 0x20d   :  { %v462_v50 = vmul.f32 %v1135_v1, %v458_v23  ;;  %v456_v28 = vmul.f32 %v1139_v10, %v452_v25 }
 0x20e   :  { %v461_v27 = vmul.f32 %v1137_v3, %v457_v55  ;;  %v455_v40 = vmul.f32 %v1141_v17, %v451_v33 }
 0x20f   :  { %v466_v30 = vadd.f32 0.2548296, %v462_v50  ;;  %v460_v36 = vadd.f32 -0.28449672, %v456_v28 }
 0x210   :  { %v465_v35 = vadd.f32 0.2548296, %v461_v27  ;;  %v459_v56 = vadd.f32 -0.28449672, %v455_v40 }
 0x211   :  { %v470_v37 = vmul.f32 %v1135_v1, %v466_v30  ;;  %v464_v48 = vmul.f32 %v1139_v10, %v460_v36  ;;  %v1147_v1 = vpop.eup %1146 }
 0x212   :  { %v469_v46 = vmul.f32 %v1137_v3, %v465_v35  ;;  %v463_v60 = vmul.f32 %v1141_v17, %v459_v56  ;;  %v413_v3 = vsel %vm409_vm7, 1.0, %v1193_v61  ;;  %v1149_v6 = vpop.eup %1148 }
 0x213   :  { %v490_v54 = vmul.f32 %v1143_v43, %v470_v37  ;;  %v468_v58 = vadd.f32 0.2548296, %v464_v48 }
 0x214   :  { %v489_v57 = vmul.f32 %v1145_v51, %v469_v46  ;;  %v467_v4 = vadd.f32 0.2548296, %v463_v60  ;;  %v551_v51 = vpop.permute.xlu0 %550 }
 0x215   :  { %v494_v59 = vsub.f32 1.0, %v490_v54  ;;  %v472_v0 = vmul.f32 %v1139_v10, %v468_v58  ;;  %v556_v54 = vpop.permute.xlu1 %555 }
 0x216   :  { %v493_v63 = vsub.f32 1.0, %v489_v57  ;;  %v471_v34 = vmul.f32 %v1141_v17, %v467_v4  ;;  %v403_v17 = vmul.f32 0.5, %v1428_v45 }
 0x217   :  { %v498_v2 = vmul.f32 %v494_v59, %v414_v62  ;;  %v492_v42 = vmul.f32 %v1147_v1, %v472_v0 }
 0x218   :  { %v497_v5 = vmul.f32 %v493_v63, %v413_v3  ;;  %v491_v10 = vmul.f32 %v1149_v6, %v471_v34  ;;  %v579_v58 = vpop.permute.xlu0 %578 }
 0x219   :  { %v502_v44 = vadd.f32 1.0, %v498_v2  ;;  %v496_v9 = vsub.f32 1.0, %v492_v42  ;;  %v584_v59 = vpop.permute.xlu1 %583 }
 0x21a   :  { %v501_v8 = vadd.f32 1.0, %v497_v5  ;;  %v495_v15 = vsub.f32 1.0, %v491_v10 }
 0x21b   :  { %v506_v11 = vmul.f32 %v502_v44, %v402_v32  ;;  %v500_v14 = vmul.f32 %v496_v9, %v416_v12  ;;  %v602_v12 = vld [vmem:[%s1521_s9 + $0x10] sm:$0xff] }
 0x21c   :  { %v505_v13 = vmul.f32 %v501_v8, %v401_v7  ;;  %v499_v53 = vmul.f32 %v495_v15, %v415_v29  ;;  %v561_v60 = vpop.permute.xlu0 %560  ;;  %v604_v15 = vld [vmem:[%s1521_s9 + $0x20] sm:$0xff]  ;;  %v606_v29 = vld [vmem:[%s1521_s9 + $0x30] sm:$0xff] }
 0x21d   :  { %v504_v49 = vadd.f32 1.0, %v500_v14  ;;  %v566_v62 = vpop.permute.xlu1 %565  ;;  %v603_v14 = vld [vmem:[%s1521_s9 + $0x18] sm:$0xff] }
 0x21e   :  { %v509_v16 = vadd.f32 %v506_v11, %v505_v13  ;;  %v503_v18 = vadd.f32 1.0, %v499_v53  ;;  %v607_v53 = vld [vmem:[%s1521_s9 + $0x38] sm:$0xff] }
 0x21f   :  { %v508_v19 = vmul.f32 %v504_v49, %v404_v31  ;;  %v608_v49 = vld [vmem:[%s1521_s9 + $0x40] sm:$0xff]  ;;  %v1196_v31 = vmov 0.0  }
 0x220   :  { %v507_v39 = vmul.f32 %v503_v18, %v403_v17  ;;  %v589_v44 = vpop.permute.xlu0 %588  ;;  %v609_v17 = vld [vmem:[%s1521_s9 + $0x48] sm:$0xff]  ;;  %v1194_v18 = vmov 0.0|0.0   ;;  %1081 = vmatprep.mubr.msk.f32.mxu1 %vm1195_vm10, %v1196_v31 }
 0x221   :  { %v594_v34 = vpop.permute.xlu1 %593  ;;  %1104 = vmatprep.subr.bf16.mxu1 %v1194_v18 }
 0x222   :  { %v510_v20 = vadd.f32 %v509_v16, %v507_v39  ;;  %v605_v16 = vld [vmem:[%s1521_s9 + $0x28] sm:$0xff] }
 0x224   :  { %v511_v52 = vadd.f32 %v510_v20, %v508_v19 }
 0x226   :  { %v512_v41 = vrot.slane %v511_v52, 4 }
 0x228   :  { %v513_v21 = vadd.f32 %v512_v41, %v511_v52  ;;  %v648_v52 = vpop.permute.xlu1 %647 }
 0x22a   :  { %v514_v22 = vrot.slane %v513_v21, 2 }
 0x22c   :  { %v515_v23 = vadd.f32 %v514_v22, %v513_v21  ;;  %v643_v21 = vpop.permute.xlu0 %642 }
 0x22e   :  { %v516_v24 = vrot.slane %v515_v23, 1 }
 0x230   :  { %v517_v55 = vadd.f32 %v516_v24, %v515_v23 }
 0x232   :  { %v519_v25 = vmul.f32 0.03125, %v517_v55 }
 0x234   :  { %v520_v47 = vsub.f32 %v505_v13, %v519_v25  ;;  %v521_v61 = vsub.f32 %v506_v11, %v519_v25  ;;  %v522_v50 = vsub.f32 %v507_v39, %v519_v25  ;;  %v523_v26 = vsub.f32 %v508_v19, %v519_v25  ;;  %v601_v13 = vld [vmem:[%s1521_s9 + $0x8] sm:$0xff]  ;;  %v658_v25 = vpop.permute.xlu1 %657 }
 0x236   :  { %v524_v27 = vmul.f32 %v520_v47, %v520_v47  ;;  %v525_v45 = vmul.f32 %v521_v61, %v521_v61  ;;  %v526_v28 = vmul.f32 %v522_v50, %v522_v50  ;;  %v527_v38 = vmul.f32 %v523_v26, %v523_v26 }
 0x238   :  { %v528_v30 = vadd.f32 %v525_v45, %v524_v27 }
 0x23a   :  { %v529_v33 = vadd.f32 %v528_v30, %v526_v28 }
 0x23c   :  { %v530_v35 = vadd.f32 %v529_v33, %v527_v38 }
 0x23e   :  { %v531_v36 = vrot.slane %v530_v35, 4 }
 0x240   :  { %v532_v37 = vadd.f32 %v531_v36, %v530_v35 }
 0x242   :  { %v533_v40 = vrot.slane %v532_v37, 2 }
 0x244   :  { %v534_v43 = vadd.f32 %v533_v40, %v532_v37  ;;  %v628_v37 = vpop.permute.xlu1 %627 }
 0x246   :  { %v535_v46 = vrot.slane %v534_v43, 1 }
 0x248   :  { %v536_v48 = vadd.f32 %v535_v46, %v534_v43 }
 0x24a   :  { %v537_v56 = vmul.f32 0.03125, %v536_v48 }
 0x24c   :  { %v538_v57 = vadd.f32 1e-05, %v537_v56 }
 0x24e   :  { %1150 = vrsqrt.f32 %v538_v57  ;;  %v638_v57 = vpop.permute.xlu1 %637 }
 0x258   :  { %v1151_v63 = vpop.eup %1150 }
 0x259   :  { %v542_v0 = vmul.f32 %v1151_v63, %v522_v50  ;;  %v540_v1 = vmul.f32 %v1151_v63, %v520_v47  ;;  %v541_v2 = vmul.f32 %v1151_v63, %v521_v61  ;;  %v543_v3 = vmul.f32 %v1151_v63, %v523_v26  ;;  %v653_v61 = vpop.permute.xlu0 %652 }
 0x25b   :  { %v568_v4 = vmul.f32 %v551_v51, %v540_v1  ;;  %v569_v5 = vmul.f32 %v556_v54, %v541_v2  ;;  %v570_v42 = vmul.f32 %v561_v60, %v542_v0  ;;  %v571_v32 = vmul.f32 %v566_v62, %v543_v3  ;;  %v815_v54 = vld [vmem:[%s1513_s1] sm:$0xff] }
 0x25d   :  { %v596_v6 = vadd.f32 %v579_v58, %v568_v4  ;;  %v597_v7 = vadd.f32 %v584_v59, %v569_v5  ;;  %v598_v8 = vadd.f32 %v589_v44, %v570_v42  ;;  %v599_v9 = vadd.f32 %v594_v34, %v571_v32  ;;  %v623_v46 = vpop.permute.xlu0 %622 }
 0x25f   :  { %v1096_v11 = vpack.c.bf16 %v597_v7, %v596_v6  ;;  %v1100_v10 = vpack.c.bf16 %v599_v9, %v598_v8 }
 0x261   :  { %1097 = vmatprep.subr.bf16.mxu0 %v1096_v11  ;;  %v633_v58 = vpop.permute.xlu0 %632 }
 0x262   :  { %1099 = vmatpush3.bf16.msra.mxu0 %v1096_v11 }
 0x263   :  { %1101 = vmatprep.subr.bf16.mxu0 %v1100_v10 }
 0x266   :  { %1103 = vmatpush3.bf16.msra.mxu0 %v1100_v10 }
 0x269   :  { %1059 = vmatmul.mubr.msk.f32.vlgmr.msra.gmra.mrb[0].mxu0 %vm303_vm1, %v601_v13  ;;  %v836_v13 = vld [vmem:[%s1514_s2] sm:$0xf]  ;;  %s1197_s2 = smov [#allocation2]  }
 0x26a   :  { %1061 = vmatprep.mubr.msk.f32.mxu0 %vm303_vm1, %v602_v12  ;;  %v663_v12 = vpop.permute.xlu0 %662  ;;  %s966_s15 = sshll.u32 %s1197_s2, 4  ;;  %s967_s15 = int_to_ptr.vmem [resolvable:$true] %s966_s15 }
 0x26b   :  { %s1168_s16 = scalar_lea.vmem %s967_s15, 16  ;;  %s1172_s17 = scalar_lea.vmem %s967_s15, 32 }
 0x26c   :  { %p1169_p0 = scmp.ne.s32.totalorder %s967_s15, %s1168_s16  ;;  %p1173_p1 = scmp.lt.s32.totalorder %s967_s15, %s967_s15 }
 0x26d   :  { %1062 = vmatmul.mubr.msk.f32.gmra.mrb[2].mxu0 %vm303_vm1, %v603_v14  ;;  %p1174_p2 = scmp.lt.s32.totalorder %s1172_s17, %s1168_s16 }
 0x26e   :  { %1064 = vmatprep.mubr.msk.f32.mxu0 %vm303_vm1, %v604_v15 }
 0x26f   :  { %p1175_p3 = por %p1174_p2, %p1173_p1 }
 0x271   :  { %1065 = vmatmul.mubr.msk.f32.gmra.mrb[4].mxu0 %vm303_vm1, %v605_v16  ;;  %p1176_p4 = pnand %p1175_p3, %p1169_p0 }
 0x272   :  { %1067 = vmatprep.mubr.msk.f32.mxu0 %vm303_vm1, %v606_v29 }
 0x275   :  { %1068 = vmatmul.mubr.msk.f32.gmra.mrb[6].mxu0 %vm303_vm1, %v607_v53 }
 0x276   :  { %1070 = vmatprep.mubr.msk.f32.mxu0 %vm303_vm1, %v608_v49 }
 0x279   :  { %1071 = vmatmul.mubr.msk.f32.gmra.mrb[8].mxu0 %vm303_vm1, %v609_v17 }
 0x33c   :  { %v1060_v39 = vpop.f32.mrb[0].mxu0 }
 0x33d   :  { %v766_v19 = vpop.f32.mrb[1].mxu0  ;;  %v772_v51 = vadd.f32 %v1060_v39, %v628_v37 }
 0x33e   :  { %v767_v56 = vadd.f32 %v766_v19, %v623_v46 }
 0x33f   :  { %v817_v59 = vsub.f32 %v815_v54, %v772_v51 }
 0x340   :  { %v1063_v20 = vpop.f32.mrb[2].mxu0  ;;  %v816_v63 = vsub.f32 %v815_v54, %v767_v56 }
 0x341   :  { %v776_v41 = vpop.f32.mrb[3].mxu0  ;;  %v782_v60 = vadd.f32 %v1063_v20, %v638_v57 }
 0x342   :  { %v777_v0 = vadd.f32 %v776_v41, %v633_v58 }
 0x343   :  { %v819_v4 = vsub.f32 %v815_v54, %v782_v60 }
 0x344   :  { %v1066_v22 = vpop.f32.mrb[4].mxu0  ;;  %v818_v32 = vsub.f32 %v815_v54, %v777_v0 }
 0x345   :  { %v792_v23 = vadd.f32 %v1066_v22, %v648_v52  ;;  %v786_v24 = vpop.f32.mrb[5].mxu0 }
 0x346   :  { %v787_v55 = vadd.f32 %v786_v24, %v643_v21 }
 0x347   :  { %v821_v47 = vsub.f32 0.0, %v792_v23 }
 0x348   :  { %v820_v50 = vsub.f32 0.0, %v787_v55  ;;  %v1069_v26 = vpop.f32.mrb[6].mxu0 }
 0x349   :  { %v826_v27 = vmul.f32 1.442695, %v821_v47  ;;  %v802_v45 = vadd.f32 %v1069_v26, %v658_v25  ;;  %v796_v28 = vpop.f32.mrb[7].mxu0 }
 0x34a   :  { %v824_v30 = vmul.f32 1.442695, %v820_v50  ;;  %v797_v38 = vadd.f32 %v796_v28, %v653_v61 }
 0x34b   :  { %1152 = vpow2.f32 %v826_v27  ;;  %v823_v33 = vsub.f32 0.0, %v802_v45  ;;  %v668_v45 = vpop.permute.xlu1 %667 }
 0x34c   :  { %1154 = vpow2.f32 %v824_v30  ;;  %v822_v35 = vsub.f32 0.0, %v797_v38  ;;  %v1486_v36 = vpop.f32.mrb[8].mxu0 }
 0x34d   :  { %v830_v40 = vmul.f32 1.442695, %v823_v33  ;;  %v806_v43 = vpop.f32.mrb[9].mxu0  ;;  %v812_v28 = vadd.f32 %v1486_v36, %v668_v45 }
 0x34e   :  { %v828_v48 = vmul.f32 1.442695, %v822_v35  ;;  %v807_v14 = vadd.f32 %v806_v43, %v663_v12 }
 0x34f   :  { %1156 = vpow2.f32 %v830_v40 }
 0x350   :  { %1158 = vpow2.f32 %v828_v48  ;;  %v915_v15 = vsel %vm914_vm11, %v807_v14, -inf }
 0x351   :  { %v916_v16 = vrot.slane %v915_v15, 4 }
 0x353   :  { %v917_v29 = vmax.f32 %v915_v15, %v916_v16 }
 0x355   :  { %v1153_v62 = vpop.eup %1152  ;;  %v918_v53 = vrot.slane %v917_v29, 2 }
 0x356   :  { %v1155_v1 = vpop.eup %1154  ;;  %v833_v2 = vmul.f32 %v1153_v62, %v817_v59 }
 0x357   :  { %v832_v3 = vmul.f32 %v1155_v1, %v816_v63  ;;  %v919_v49 = vmax.f32 %v917_v29, %v918_v53 }
 0x358   :  { %v838_v5 = vmul.f32 %v833_v2, %v833_v2 }
 0x359   :  { %v1157_v42 = vpop.eup %1156  ;;  %v837_v44 = vmul.f32 %v832_v3, %v832_v3  ;;  %v920_v17 = vrot.slane %v919_v49, 1 }
 0x35a   :  { %v1159_v34 = vpop.eup %1158  ;;  %v835_v6 = vmul.f32 %v1157_v42, %v819_v4 }
 0x35b   :  { %v1105_v7 = vpack.c.bf16 %v838_v5, %v837_v44  ;;  %v834_v8 = vmul.f32 %v1159_v34, %v818_v32  ;;  %v921_v31 = vmax.f32 %v919_v49, %v920_v17 }
 0x35c   :  { %v840_v9 = vmul.f32 %v835_v6, %v835_v6 }
 0x35d   :  { %1106 = vmatpush3.bf16.msra.mxu1 %v1105_v7  ;;  %v839_v11 = vmul.f32 %v834_v8, %v834_v8 }
 0x35e   :  { %1107 = vmatprep.subr.bf16.mxu1 %v1194_v18  ;;  %v922_v18 = vsub.f32 %v807_v14, %v921_v31 }
 0x35f   :  { %v1108_v10 = vpack.c.bf16 %v840_v9, %v839_v11 }
 0x360   :  { %v923_v39 = vmul.f32 1.442695, %v922_v18 }
 0x361   :  { %1109 = vmatpush3.bf16.msra.mxu1 %v1108_v10 }
 0x362   :  { %1160 = vpow2.f32 %v923_v39 }
 0x364   :  { %1082 = vmatmul.mubr.msk.f32.vlgmr.msra.gmra.mrb[8].mxu1 %vm303_vm1, %v836_v13 }
 0x36c   :  { %v1161_v19 = vpop.eup %1160 }
 0x36d   :  { %v925_v20 = vsel %vm914_vm11, %v1161_v19, 0.0 }
 0x36e   :  { %v926_v52 = vrot.slane %v925_v20, 4 }
 0x370   :  { %v927_v41 = vadd.f32 %v926_v52, %v925_v20 }
 0x372   :  { %v928_v21 = vrot.slane %v927_v41, 2 }
 0x374   :  { %v929_v22 = vadd.f32 %v928_v21, %v927_v41 }
 0x376   :  { %v930_v23 = vrot.slane %v929_v22, 1 }
 0x378   :  { %v931_v24 = vadd.f32 %v930_v23, %v929_v22 }
 0x37a   :  { %1162 = vlog2.f32 %v931_v24 }
 0x384   :  { %v1163_v55 = vpop.eup %1162 }
 0x385   :  { %v933_v25 = vmul.f32 0.6931472, %v1163_v55 }
 0x387   :  { %v934_v47 = vsub.f32 %v922_v18, %v933_v25 }
 0x389   :  { %v935_v50 = vadd.f32 -7.351508, %v934_v47 }
 0x437   :  { %v910_v61 = vpop.f32.mrb[8].mxu1 }
 0x438   :  { %v936_v26 = vmul.f32 0.5, %v910_v61  ;;  %v1083_v27 = vpop.f32.mrb[9].mxu1 }
 0x43a   :  { %v937_v30 = vsub.f32 %v935_v50, %v936_v26 }
 0x43c   :  { %v938_v38 = vsub.f32 %v937_v30, %v812_v28 }
 0x43e   :  { %v939_v33 = vsel %vm914_vm11, %v938_v38, -inf }
 0x43f   :  { %v940_v35 = vrot.slane %v939_v33, 4 }
 0x441   :  { %v941_v37 = vmax.f32 %v939_v33, %v940_v35 }
 0x443   :  { %v942_v40 = vrot.slane %v941_v37, 2 }
 0x445   :  { %v943_v43 = vmax.f32 %v941_v37, %v942_v40 }
 0x447   :  { %v944_v46 = vrot.slane %v943_v43, 1 }
 0x449   :  { %v945_v48 = vmax.f32 %v943_v43, %v944_v46 }
 0x44b   :  { %v946_v51 = vsub.f32 %v938_v38, %v945_v48 }
 0x44d   :  { %v947_v54 = vmul.f32 1.442695, %v946_v51 }
 0x44f   :  { %1164 = vpow2.f32 %v947_v54 }
 0x459   :  { %v1165_v56 = vpop.eup %1164 }
 0x45a   :  { %v949_v57 = vsel %vm914_vm11, %v1165_v56, 0.0 }
 0x45b   :  { %v950_v58 = vrot.slane %v949_v57, 4 }
 0x45d   :  { %v951_v59 = vadd.f32 %v950_v58, %v949_v57 }
 0x45f   :  { %v952_v60 = vrot.slane %v951_v59, 2 }
 0x461   :  { %v953_v36 = vadd.f32 %v952_v60, %v951_v59 }
 0x463   :  { %v954_v62 = vrot.slane %v953_v36, 1 }
 0x465   :  { %v955_v63 = vadd.f32 %v954_v62, %v953_v36 }
 0x467   :  { %1166 = vlog2.f32 %v955_v63 }
 0x471   :  { %v1167_v0 = vpop.eup %1166 }
 0x472   :  { %v957_v1 = vmul.f32 0.6931472, %v1167_v0 }
 0x474   :  { %v958_v2 = vadd.f32 %v957_v1, %v945_v48 }
 0x476   :  { %959 = vst [vmem:[#allocation2] sm:$0x1] %v958_v2 }
 0x477   :  { %1179 = shalt.err (!%p1176_p4)
}
 0x478   :  { %s1180_s20 = scalar_lea.hbm %s1523_s11, 16 }
 0x479   :  { %p1181_p5 = scmp.ne.s32.totalorder %s1523_s11, %s1180_s20  ;;  %p1184_p6 = scmp.lt.u32.totalorder %s1180_s20, %s1523_s11 }
 0x47b   :  { %p1186_p7 = pnand %p1184_p6, %p1181_p5 }
 0x47d   :  { %1189 = shalt.err (!%p1186_p7)
}
 0x47e   :  { %969 = dma.vmem_to_hbm [thread:$0]  %s967_s15, 16, %s1523_s11, [#allocation3]  }
 0x47f   :  { %1190 = dma.done.wait [#allocation3], 16  }
 0x480   :  { %1191 = vsyncadd [#allocation3], 4294967280 }
 0x481   :  { %973 = vsyncpa [#allocation3], 1 }

</bundles_post_ra>
